<compile_context>
chip_gen: v7x
topology: tpu7x:2x2x1
jax: 0.10.0
libtpu: 0.0.40
codegen_flags: <defaults>
</compile_context>

<pallas_src>
import functools

import jax
import jax.numpy as jnp
from jax.experimental import pallas as pl
from jax.experimental.pallas import tpu as pltpu

_LANE = 128


def _re_head_kernel(ss_ref, os_ref,                           # scalar prefetch (SMEM)
                    pooled_hbm, w1_hbm, b1_hbm, w2_hbm, b2_hbm,  # inputs (HBM, pl.ANY)
                    logits_ref,                               # output (VMEM)
                    emb, w1_v, b1_v, w2_v, b2_v,              # VMEM scratch
                    gsem, wsem):                              # DMA semaphores
    B, two_h = emb.shape
    H = two_h // 2

    # --- gather: read the ss/os scalars *before* any DMA wait (keeps the SMEM
    # sst->sld forwarding path clean) and start the 2B tiny row DMAs first so
    # they complete underneath the large weight copies.  ss row -> emb[b, :H],
    # os row -> emb[b, H:].  pooled never enters VMEM as a whole.
    # TODO(synk): switch to lax.fori_loop with dynamic sem indices if B grows
    # beyond ~16-32 (the static unroll bloats the bundle stream at large B).
    gathers = []
    for b in range(B):                    # B is small & static -> unrolled
        s = ss_ref[b]
        o = os_ref[b]
        gathers.append(pltpu.make_async_copy(
            pooled_hbm.at[b, pl.ds(s, 1), :],
            emb.at[pl.ds(b, 1), pl.ds(0, H)],
            gsem.at[0, b]))
        gathers.append(pltpu.make_async_copy(
            pooled_hbm.at[b, pl.ds(o, 1), :],
            emb.at[pl.ds(b, 1), pl.ds(H, H)],
            gsem.at[1, b]))
    for cp in gathers:
        cp.start()

    # --- weights: manual single-buffered DMAs (grid=(1,) so double-buffering
    # them would be pure VMEM waste), issued after the gathers so both overlap.
    w1_cp = pltpu.make_async_copy(w1_hbm, w1_v, wsem.at[0]); w1_cp.start()
    b1_cp = pltpu.make_async_copy(b1_hbm, b1_v, wsem.at[1]); b1_cp.start()
    w2_cp = pltpu.make_async_copy(w2_hbm, w2_v, wsem.at[2]); w2_cp.start()
    b2_cp = pltpu.make_async_copy(b2_hbm, b2_v, wsem.at[3]); b2_cp.start()

    for cp in gathers:
        cp.wait()
    w1_cp.wait()
    b1_cp.wait()

    # --- classifier: Linear(2H,H) -> ReLU -> Dropout(p=0)=identity -> Linear(H,C)
    # bf16 operands on the MXU, f32 accumulation; elementwise math stays f32.
    h = emb[...].astype(jnp.bfloat16)                                   # (B, 2H)
    z = jnp.dot(h, w1_v[...], preferred_element_type=jnp.float32) + b1_v[...]
    z = jnp.maximum(z, 0.0)                                             # ReLU

    w2_cp.wait()
    b2_cp.wait()
    logits_ref[...] = (jnp.dot(z.astype(jnp.bfloat16), w2_v[...],
                               preferred_element_type=jnp.float32)
                       + b2_v[...]).astype(logits_ref.dtype)            # (B, Cpad)


def prepare_classifier_params(w1, b1, w2, b2):
    """One-time (init-time) weight preprocessing: bf16 cast + lane padding.

    Hoisted out of the per-call hot path so each forward step does not re-read
    w1 in f32 and re-write it in bf16 (which would roughly match the kernel's
    own DMA bytes at roberta-large sizes).
    """
    two_h, H = w1.shape
    assert two_h == 2 * H
    assert H % _LANE == 0, "hidden size must be lane-aligned (roberta-large: 1024)"
    C = w2.shape[1]
    Cpad = ((C + _LANE - 1) // _LANE) * _LANE
    w1_bf = jnp.asarray(w1, jnp.bfloat16)
    b1_f = jnp.asarray(b1, jnp.float32).reshape(1, H)
    w2_pad = jnp.zeros((H, Cpad), jnp.bfloat16).at[:, :C].set(
        jnp.asarray(w2, jnp.bfloat16))
    b2_pad = jnp.zeros((1, Cpad), jnp.float32).at[:, :C].set(
        jnp.asarray(b2, jnp.float32).reshape(-1))
    return {"w1": w1_bf, "b1": b1_f, "w2": w2_pad, "b2": b2_pad,
            "num_classes": C}


@functools.partial(jax.jit, static_argnames=("num_classes",))
def _re_forward(pooled, w1_bf, b1_f, w2_pad, b2_pad, ss, os_idx, labels, *,
                num_classes):
    B, S, H = pooled.shape
    Cpad = w2_pad.shape[1]

    grid_spec = pltpu.PrefetchScalarGridSpec(
        num_scalar_prefetch=2,            # ss, os -> SMEM, drive the row gather
        grid=(1,),
        in_specs=[
            pl.BlockSpec(memory_space=pl.ANY),   # pooled stays in HBM (row gather)
            pl.BlockSpec(memory_space=pl.ANY),   # w1  (bf16)
            pl.BlockSpec(memory_space=pl.ANY),   # b1  (f32)
            pl.BlockSpec(memory_space=pl.ANY),   # w2  (bf16, lane-padded)
            pl.BlockSpec(memory_space=pl.ANY),   # b2  (f32, lane-padded)
        ],
        out_specs=pl.BlockSpec((B, Cpad), lambda i, ss, os: (0, 0)),  # lane-dense
        scratch_shapes=[
            pltpu.VMEM((B, 2 * H), jnp.float32),      # gathered [ss | os] embeddings
            pltpu.VMEM((2 * H, H), jnp.bfloat16),     # w1 (single-buffered)
            pltpu.VMEM((1, H), jnp.float32),          # b1
            pltpu.VMEM((H, Cpad), jnp.bfloat16),      # w2
            pltpu.VMEM((1, Cpad), jnp.float32),       # b2
            pltpu.SemaphoreType.DMA((2, B)),          # gather sems
            pltpu.SemaphoreType.DMA((4,)),            # weight sems
        ],
    )
    logits_pad = pl.pallas_call(
        _re_head_kernel,
        grid_spec=grid_spec,
        out_shape=jax.ShapeDtypeStruct((B, Cpad), jnp.float32),
        compiler_params=pltpu.CompilerParams(
            dimension_semantics=("arbitrary",)),
    )(ss, os_idx, pooled, w1_bf, b1_f, w2_pad, b2_pad)

    logits = logits_pad[:, :num_classes]

    # CrossEntropyLoss(mean) with PyTorch's ignore_index=-100 semantics,
    # computed host-side on the tiny (B, C) logits (trivial VPU op; keeps the
    # kernel epilogue free of the padded-tile loss store and XLU reduction).
    valid = labels != -100
    safe = jnp.where(valid, labels, 0)
    lse = jax.scipy.special.logsumexp(logits, axis=-1)
    picked = jnp.take_along_axis(logits, safe[:, None], axis=-1)[:, 0]
    nll = jnp.where(valid, lse - picked, 0.0)
    denom = jnp.maximum(jnp.sum(valid.astype(jnp.float32)), 1.0)
    loss = jnp.sum(nll) / denom
    return loss, logits


def re_model_head(pooled, params, ss, os_idx, labels):
    return _re_forward(pooled, params["w1"], params["b1"], params["w2"],
                       params["b2"], ss, os_idx, labels,
                       num_classes=params["num_classes"])


if __name__ == "__main__":
    B, S, H, C = 2, 16, 128, 42
    key = jax.random.PRNGKey(0)
    k = jax.random.split(key, 8)

    # Deterministic stand-in for the encoder output and classifier parameters.
    pooled = jax.random.normal(k[0], (B, S, H), jnp.float32)
    w1 = jax.random.normal(k[1], (2 * H, H), jnp.float32) * 0.05
    b1 = jax.random.normal(k[2], (1, H), jnp.float32) * 0.05
    w2 = jax.random.normal(k[3], (H, C), jnp.float32) * 0.05
    b2 = jax.random.normal(k[4], (1, C), jnp.float32) * 0.05
    ss = jax.random.randint(k[5], (B,), 0, S, dtype=jnp.int32)
    os_ = jax.random.randint(k[6], (B,), 0, S, dtype=jnp.int32)
    labels = jax.random.randint(k[7], (B,), 0, C, dtype=jnp.int32)

    # One-time weight preprocessing (hoisted out of the per-call hot path).
    params = prepare_classifier_params(w1, b1, w2, b2)

    loss, logits = re_model_head(pooled, params, ss, os_, labels)
    jax.block_until_ready((loss, logits))

    # Pure-JAX reference (emulating the kernel's bf16 matmul operands with f32
    # accumulation; elementwise in f32).
    idx = jnp.arange(B)
    bf = lambda x: x.astype(jnp.bfloat16).astype(jnp.float32)
    h = jnp.concatenate([pooled[idx, ss], pooled[idx, os_]], axis=-1)
    z = jnp.maximum(bf(h) @ bf(w1) + b1, 0.0)
    ref_logits = bf(z) @ bf(w2) + b2
    lse = jax.scipy.special.logsumexp(ref_logits, axis=-1)
    ref_loss = jnp.mean(lse - ref_logits[idx, labels])

    assert jnp.allclose(logits, ref_logits, atol=1e-2, rtol=1e-2), "logits mismatch"
    assert jnp.allclose(loss, ref_loss, atol=1e-2, rtol=1e-2), "loss mismatch"
    print("KERNEL_OK")
</pallas_src>

<mosaic_0001>
module attributes {stable_mosaic.version = 11 : i64} {
  func.func @_re_head_kernel(%arg0: i32, %arg1: memref<2xi32, #tpu.memory_space<smem>>, %arg2: memref<2xi32, #tpu.memory_space<smem>>, %arg3: memref<2x16x128xf32, #tpu.memory_space<any>>, %arg4: memref<256x128xbf16, #tpu.memory_space<any>>, %arg5: memref<1x128xf32, #tpu.memory_space<any>>, %arg6: memref<128x128xbf16, #tpu.memory_space<any>>, %arg7: memref<1x128xf32, #tpu.memory_space<any>>, %arg8: memref<2x128xf32, #tpu.memory_space<vmem>>, %arg9: memref<2x256xf32, #tpu.memory_space<vmem>>, %arg10: memref<256x128xbf16, #tpu.memory_space<vmem>>, %arg11: memref<1x128xf32, #tpu.memory_space<vmem>>, %arg12: memref<128x128xbf16, #tpu.memory_space<vmem>>, %arg13: memref<1x128xf32, #tpu.memory_space<vmem>>, %arg14: memref<2x2x!tpu.dma_semaphore, #tpu.memory_space<semaphore_mem>>, %arg15: memref<4x!tpu.dma_semaphore, #tpu.memory_space<semaphore_mem>>) attributes {dimension_semantics = [#tpu.dimension_semantics<arbitrary>], iteration_bounds = array<i64: 1>, scalar_prefetch = 2 : i64, scratch_operands = 7 : i64, tpu.core_type = #tpu.core_type<tc>, window_params = [{}, {}, {}, {}, {}, {pipeline_mode = #tpu.pipeline_mode<synchronous>, transform_indices = @transform_5, window_bounds = array<i64: 2, 128>}]} {
    %c0 = arith.constant 0 : index
    %0 = memref.load %arg1[%c0] : memref<2xi32, #tpu.memory_space<smem>>
    %c0_0 = arith.constant 0 : index
    %1 = memref.load %arg2[%c0_0] : memref<2xi32, #tpu.memory_space<smem>>
    %c1 = arith.constant 1 : index
    %2 = memref.load %arg1[%c1] : memref<2xi32, #tpu.memory_space<smem>>
    %c1_1 = arith.constant 1 : index
    %3 = memref.load %arg2[%c1_1] : memref<2xi32, #tpu.memory_space<smem>>
    %c0_i32 = arith.constant 0 : i32
    %c0_i32_2 = arith.constant 0 : i32
    %c0_i32_3 = arith.constant 0 : i32
    %c0_i32_4 = arith.constant 0 : i32
    %4 = tpu.memref_slice %arg3[%c0_i32, %0, %c0_i32_4] : memref<2x16x128xf32, #tpu.memory_space<any>> -> memref<1x1x128xf32, #tpu.memory_space<any>>
    %5 = tpu.memref_squeeze %4 : memref<1x1x128xf32, #tpu.memory_space<any>> -> memref<1x128xf32, #tpu.memory_space<any>>
    %c0_i32_5 = arith.constant 0 : i32
    %c0_i32_6 = arith.constant 0 : i32
    %6 = tpu.memref_slice %arg9[%c0_i32_5, %c0_i32_6] : memref<2x256xf32, #tpu.memory_space<vmem>> -> memref<1x128xf32, #tpu.memory_space<vmem>>
    %7 = tpu.memref_slice %arg14[%c0_i32_2, %c0_i32_3] : memref<2x2x!tpu.dma_semaphore, #tpu.memory_space<semaphore_mem>> -> memref<1x1x!tpu.dma_semaphore, #tpu.memory_space<semaphore_mem>>
    %8 = tpu.memref_squeeze %7 : memref<1x1x!tpu.dma_semaphore, #tpu.memory_space<semaphore_mem>> -> memref<!tpu.dma_semaphore, #tpu.memory_space<semaphore_mem>>
    tpu.enqueue_dma source(%5 : memref<1x128xf32, #tpu.memory_space<any>>) target(%6 : memref<1x128xf32, #tpu.memory_space<vmem>>) target_semaphore(%8 : memref<!tpu.dma_semaphore, #tpu.memory_space<semaphore_mem>>)
    %c0_i32_7 = arith.constant 0 : i32
    %c1_i32 = arith.constant 1 : i32
    %c0_i32_8 = arith.constant 0 : i32
    %c0_i32_9 = arith.constant 0 : i32
    %9 = tpu.memref_slice %arg3[%c0_i32_7, %1, %c0_i32_9] : memref<2x16x128xf32, #tpu.memory_space<any>> -> memref<1x1x128xf32, #tpu.memory_space<any>>
    %10 = tpu.memref_squeeze %9 : memref<1x1x128xf32, #tpu.memory_space<any>> -> memref<1x128xf32, #tpu.memory_space<any>>
    %c0_i32_10 = arith.constant 0 : i32
    %c128_i32 = arith.constant 128 : i32
    %11 = tpu.memref_slice %arg9[%c0_i32_10, %c128_i32] : memref<2x256xf32, #tpu.memory_space<vmem>> -> memref<1x128xf32, #tpu.memory_space<vmem>>
    %12 = tpu.memref_slice %arg14[%c1_i32, %c0_i32_8] : memref<2x2x!tpu.dma_semaphore, #tpu.memory_space<semaphore_mem>> -> memref<1x1x!tpu.dma_semaphore, #tpu.memory_space<semaphore_mem>>
    %13 = tpu.memref_squeeze %12 : memref<1x1x!tpu.dma_semaphore, #tpu.memory_space<semaphore_mem>> -> memref<!tpu.dma_semaphore, #tpu.memory_space<semaphore_mem>>
    tpu.enqueue_dma source(%10 : memref<1x128xf32, #tpu.memory_space<any>>) target(%11 : memref<1x128xf32, #tpu.memory_space<vmem>>) target_semaphore(%13 : memref<!tpu.dma_semaphore, #tpu.memory_space<semaphore_mem>>)
    %c1_i32_11 = arith.constant 1 : i32
    %c0_i32_12 = arith.constant 0 : i32
    %c1_i32_13 = arith.constant 1 : i32
    %c0_i32_14 = arith.constant 0 : i32
    %14 = tpu.memref_slice %arg3[%c1_i32_11, %2, %c0_i32_14] : memref<2x16x128xf32, #tpu.memory_space<any>> -> memref<1x1x128xf32, #tpu.memory_space<any>>
    %15 = tpu.memref_squeeze %14 : memref<1x1x128xf32, #tpu.memory_space<any>> -> memref<1x128xf32, #tpu.memory_space<any>>
    %c1_i32_15 = arith.constant 1 : i32
    %c0_i32_16 = arith.constant 0 : i32
    %16 = tpu.memref_slice %arg9[%c1_i32_15, %c0_i32_16] : memref<2x256xf32, #tpu.memory_space<vmem>> -> memref<1x128xf32, #tpu.memory_space<vmem>>
    %17 = tpu.memref_slice %arg14[%c0_i32_12, %c1_i32_13] : memref<2x2x!tpu.dma_semaphore, #tpu.memory_space<semaphore_mem>> -> memref<1x1x!tpu.dma_semaphore, #tpu.memory_space<semaphore_mem>>
    %18 = tpu.memref_squeeze %17 : memref<1x1x!tpu.dma_semaphore, #tpu.memory_space<semaphore_mem>> -> memref<!tpu.dma_semaphore, #tpu.memory_space<semaphore_mem>>
    tpu.enqueue_dma source(%15 : memref<1x128xf32, #tpu.memory_space<any>>) target(%16 : memref<1x128xf32, #tpu.memory_space<vmem>>) target_semaphore(%18 : memref<!tpu.dma_semaphore, #tpu.memory_space<semaphore_mem>>)
    %c1_i32_17 = arith.constant 1 : i32
    %c1_i32_18 = arith.constant 1 : i32
    %c1_i32_19 = arith.constant 1 : i32
    %c0_i32_20 = arith.constant 0 : i32
    %19 = tpu.memref_slice %arg3[%c1_i32_17, %3, %c0_i32_20] : memref<2x16x128xf32, #tpu.memory_space<any>> -> memref<1x1x128xf32, #tpu.memory_space<any>>
    %20 = tpu.memref_squeeze %19 : memref<1x1x128xf32, #tpu.memory_space<any>> -> memref<1x128xf32, #tpu.memory_space<any>>
    %c1_i32_21 = arith.constant 1 : i32
    %c128_i32_22 = arith.constant 128 : i32
    %21 = tpu.memref_slice %arg9[%c1_i32_21, %c128_i32_22] : memref<2x256xf32, #tpu.memory_space<vmem>> -> memref<1x128xf32, #tpu.memory_space<vmem>>
    %22 = tpu.memref_slice %arg14[%c1_i32_18, %c1_i32_19] : memref<2x2x!tpu.dma_semaphore, #tpu.memory_space<semaphore_mem>> -> memref<1x1x!tpu.dma_semaphore, #tpu.memory_space<semaphore_mem>>
    %23 = tpu.memref_squeeze %22 : memref<1x1x!tpu.dma_semaphore, #tpu.memory_space<semaphore_mem>> -> memref<!tpu.dma_semaphore, #tpu.memory_space<semaphore_mem>>
    tpu.enqueue_dma source(%20 : memref<1x128xf32, #tpu.memory_space<any>>) target(%21 : memref<1x128xf32, #tpu.memory_space<vmem>>) target_semaphore(%23 : memref<!tpu.dma_semaphore, #tpu.memory_space<semaphore_mem>>)
    %c0_i32_23 = arith.constant 0 : i32
    %24 = tpu.memref_slice %arg15[%c0_i32_23] : memref<4x!tpu.dma_semaphore, #tpu.memory_space<semaphore_mem>> -> memref<1x!tpu.dma_semaphore, #tpu.memory_space<semaphore_mem>>
    %25 = tpu.memref_squeeze %24 : memref<1x!tpu.dma_semaphore, #tpu.memory_space<semaphore_mem>> -> memref<!tpu.dma_semaphore, #tpu.memory_space<semaphore_mem>>
    tpu.enqueue_dma source(%arg4 : memref<256x128xbf16, #tpu.memory_space<any>>) target(%arg10 : memref<256x128xbf16, #tpu.memory_space<vmem>>) target_semaphore(%25 : memref<!tpu.dma_semaphore, #tpu.memory_space<semaphore_mem>>)
    %c1_i32_24 = arith.constant 1 : i32
    %26 = tpu.memref_slice %arg15[%c1_i32_24] : memref<4x!tpu.dma_semaphore, #tpu.memory_space<semaphore_mem>> -> memref<1x!tpu.dma_semaphore, #tpu.memory_space<semaphore_mem>>
    %27 = tpu.memref_squeeze %26 : memref<1x!tpu.dma_semaphore, #tpu.memory_space<semaphore_mem>> -> memref<!tpu.dma_semaphore, #tpu.memory_space<semaphore_mem>>
    tpu.enqueue_dma source(%arg5 : memref<1x128xf32, #tpu.memory_space<any>>) target(%arg11 : memref<1x128xf32, #tpu.memory_space<vmem>>) target_semaphore(%27 : memref<!tpu.dma_semaphore, #tpu.memory_space<semaphore_mem>>)
    %c2_i32 = arith.constant 2 : i32
    %28 = tpu.memref_slice %arg15[%c2_i32] : memref<4x!tpu.dma_semaphore, #tpu.memory_space<semaphore_mem>> -> memref<1x!tpu.dma_semaphore, #tpu.memory_space<semaphore_mem>>
    %29 = tpu.memref_squeeze %28 : memref<1x!tpu.dma_semaphore, #tpu.memory_space<semaphore_mem>> -> memref<!tpu.dma_semaphore, #tpu.memory_space<semaphore_mem>>
    tpu.enqueue_dma source(%arg6 : memref<128x128xbf16, #tpu.memory_space<any>>) target(%arg12 : memref<128x128xbf16, #tpu.memory_space<vmem>>) target_semaphore(%29 : memref<!tpu.dma_semaphore, #tpu.memory_space<semaphore_mem>>)
    %c3_i32 = arith.constant 3 : i32
    %30 = tpu.memref_slice %arg15[%c3_i32] : memref<4x!tpu.dma_semaphore, #tpu.memory_space<semaphore_mem>> -> memref<1x!tpu.dma_semaphore, #tpu.memory_space<semaphore_mem>>
    %31 = tpu.memref_squeeze %30 : memref<1x!tpu.dma_semaphore, #tpu.memory_space<semaphore_mem>> -> memref<!tpu.dma_semaphore, #tpu.memory_space<semaphore_mem>>
    tpu.enqueue_dma source(%arg7 : memref<1x128xf32, #tpu.memory_space<any>>) target(%arg13 : memref<1x128xf32, #tpu.memory_space<vmem>>) target_semaphore(%31 : memref<!tpu.dma_semaphore, #tpu.memory_space<semaphore_mem>>)
    %c0_i32_25 = arith.constant 0 : i32
    %c0_i32_26 = arith.constant 0 : i32
    %c0_i32_27 = arith.constant 0 : i32
    %c0_i32_28 = arith.constant 0 : i32
    %32 = tpu.memref_slice %arg3[%c0_i32_25, %0, %c0_i32_28] : memref<2x16x128xf32, #tpu.memory_space<any>> -> memref<1x1x128xf32, #tpu.memory_space<any>>
    %33 = tpu.memref_squeeze %32 : memref<1x1x128xf32, #tpu.memory_space<any>> -> memref<1x128xf32, #tpu.memory_space<any>>
    %c0_i32_29 = arith.constant 0 : i32
    %c0_i32_30 = arith.constant 0 : i32
    %34 = tpu.memref_slice %arg9[%c0_i32_29, %c0_i32_30] : memref<2x256xf32, #tpu.memory_space<vmem>> -> memref<1x128xf32, #tpu.memory_space<vmem>>
    %35 = tpu.memref_slice %arg14[%c0_i32_26, %c0_i32_27] : memref<2x2x!tpu.dma_semaphore, #tpu.memory_space<semaphore_mem>> -> memref<1x1x!tpu.dma_semaphore, #tpu.memory_space<semaphore_mem>>
    %36 = tpu.memref_squeeze %35 : memref<1x1x!tpu.dma_semaphore, #tpu.memory_space<semaphore_mem>> -> memref<!tpu.dma_semaphore, #tpu.memory_space<semaphore_mem>>
    tpu.wait_dma2 semaphore(%36 : memref<!tpu.dma_semaphore, #tpu.memory_space<semaphore_mem>>) src(%33 : memref<1x128xf32, #tpu.memory_space<any>>) dst(%34 : memref<1x128xf32, #tpu.memory_space<vmem>>)
    %c0_i32_31 = arith.constant 0 : i32
    %c1_i32_32 = arith.constant 1 : i32
    %c0_i32_33 = arith.constant 0 : i32
    %c0_i32_34 = arith.constant 0 : i32
    %37 = tpu.memref_slice %arg3[%c0_i32_31, %1, %c0_i32_34] : memref<2x16x128xf32, #tpu.memory_space<any>> -> memref<1x1x128xf32, #tpu.memory_space<any>>
    %38 = tpu.memref_squeeze %37 : memref<1x1x128xf32, #tpu.memory_space<any>> -> memref<1x128xf32, #tpu.memory_space<any>>
    %c0_i32_35 = arith.constant 0 : i32
    %c128_i32_36 = arith.constant 128 : i32
    %39 = tpu.memref_slice %arg9[%c0_i32_35, %c128_i32_36] : memref<2x256xf32, #tpu.memory_space<vmem>> -> memref<1x128xf32, #tpu.memory_space<vmem>>
    %40 = tpu.memref_slice %arg14[%c1_i32_32, %c0_i32_33] : memref<2x2x!tpu.dma_semaphore, #tpu.memory_space<semaphore_mem>> -> memref<1x1x!tpu.dma_semaphore, #tpu.memory_space<semaphore_mem>>
    %41 = tpu.memref_squeeze %40 : memref<1x1x!tpu.dma_semaphore, #tpu.memory_space<semaphore_mem>> -> memref<!tpu.dma_semaphore, #tpu.memory_space<semaphore_mem>>
    tpu.wait_dma2 semaphore(%41 : memref<!tpu.dma_semaphore, #tpu.memory_space<semaphore_mem>>) src(%38 : memref<1x128xf32, #tpu.memory_space<any>>) dst(%39 : memref<1x128xf32, #tpu.memory_space<vmem>>)
    %c1_i32_37 = arith.constant 1 : i32
    %c0_i32_38 = arith.constant 0 : i32
    %c1_i32_39 = arith.constant 1 : i32
    %c0_i32_40 = arith.constant 0 : i32
    %42 = tpu.memref_slice %arg3[%c1_i32_37, %2, %c0_i32_40] : memref<2x16x128xf32, #tpu.memory_space<any>> -> memref<1x1x128xf32, #tpu.memory_space<any>>
    %43 = tpu.memref_squeeze %42 : memref<1x1x128xf32, #tpu.memory_space<any>> -> memref<1x128xf32, #tpu.memory_space<any>>
    %c1_i32_41 = arith.constant 1 : i32
    %c0_i32_42 = arith.constant 0 : i32
    %44 = tpu.memref_slice %arg9[%c1_i32_41, %c0_i32_42] : memref<2x256xf32, #tpu.memory_space<vmem>> -> memref<1x128xf32, #tpu.memory_space<vmem>>
    %45 = tpu.memref_slice %arg14[%c0_i32_38, %c1_i32_39] : memref<2x2x!tpu.dma_semaphore, #tpu.memory_space<semaphore_mem>> -> memref<1x1x!tpu.dma_semaphore, #tpu.memory_space<semaphore_mem>>
    %46 = tpu.memref_squeeze %45 : memref<1x1x!tpu.dma_semaphore, #tpu.memory_space<semaphore_mem>> -> memref<!tpu.dma_semaphore, #tpu.memory_space<semaphore_mem>>
    tpu.wait_dma2 semaphore(%46 : memref<!tpu.dma_semaphore, #tpu.memory_space<semaphore_mem>>) src(%43 : memref<1x128xf32, #tpu.memory_space<any>>) dst(%44 : memref<1x128xf32, #tpu.memory_space<vmem>>)
    %c1_i32_43 = arith.constant 1 : i32
    %c1_i32_44 = arith.constant 1 : i32
    %c1_i32_45 = arith.constant 1 : i32
    %c0_i32_46 = arith.constant 0 : i32
    %47 = tpu.memref_slice %arg3[%c1_i32_43, %3, %c0_i32_46] : memref<2x16x128xf32, #tpu.memory_space<any>> -> memref<1x1x128xf32, #tpu.memory_space<any>>
    %48 = tpu.memref_squeeze %47 : memref<1x1x128xf32, #tpu.memory_space<any>> -> memref<1x128xf32, #tpu.memory_space<any>>
    %c1_i32_47 = arith.constant 1 : i32
    %c128_i32_48 = arith.constant 128 : i32
    %49 = tpu.memref_slice %arg9[%c1_i32_47, %c128_i32_48] : memref<2x256xf32, #tpu.memory_space<vmem>> -> memref<1x128xf32, #tpu.memory_space<vmem>>
    %50 = tpu.memref_slice %arg14[%c1_i32_44, %c1_i32_45] : memref<2x2x!tpu.dma_semaphore, #tpu.memory_space<semaphore_mem>> -> memref<1x1x!tpu.dma_semaphore, #tpu.memory_space<semaphore_mem>>
    %51 = tpu.memref_squeeze %50 : memref<1x1x!tpu.dma_semaphore, #tpu.memory_space<semaphore_mem>> -> memref<!tpu.dma_semaphore, #tpu.memory_space<semaphore_mem>>
    tpu.wait_dma2 semaphore(%51 : memref<!tpu.dma_semaphore, #tpu.memory_space<semaphore_mem>>) src(%48 : memref<1x128xf32, #tpu.memory_space<any>>) dst(%49 : memref<1x128xf32, #tpu.memory_space<vmem>>)
    %c0_i32_49 = arith.constant 0 : i32
    %52 = tpu.memref_slice %arg15[%c0_i32_49] : memref<4x!tpu.dma_semaphore, #tpu.memory_space<semaphore_mem>> -> memref<1x!tpu.dma_semaphore, #tpu.memory_space<semaphore_mem>>
    %53 = tpu.memref_squeeze %52 : memref<1x!tpu.dma_semaphore, #tpu.memory_space<semaphore_mem>> -> memref<!tpu.dma_semaphore, #tpu.memory_space<semaphore_mem>>
    tpu.wait_dma2 semaphore(%53 : memref<!tpu.dma_semaphore, #tpu.memory_space<semaphore_mem>>) src(%arg4 : memref<256x128xbf16, #tpu.memory_space<any>>) dst(%arg10 : memref<256x128xbf16, #tpu.memory_space<vmem>>)
    %c1_i32_50 = arith.constant 1 : i32
    %54 = tpu.memref_slice %arg15[%c1_i32_50] : memref<4x!tpu.dma_semaphore, #tpu.memory_space<semaphore_mem>> -> memref<1x!tpu.dma_semaphore, #tpu.memory_space<semaphore_mem>>
    %55 = tpu.memref_squeeze %54 : memref<1x!tpu.dma_semaphore, #tpu.memory_space<semaphore_mem>> -> memref<!tpu.dma_semaphore, #tpu.memory_space<semaphore_mem>>
    tpu.wait_dma2 semaphore(%55 : memref<!tpu.dma_semaphore, #tpu.memory_space<semaphore_mem>>) src(%arg5 : memref<1x128xf32, #tpu.memory_space<any>>) dst(%arg11 : memref<1x128xf32, #tpu.memory_space<vmem>>)
    %c0_51 = arith.constant 0 : index
    %c0_52 = arith.constant 0 : index
    %56 = vector.load %arg9[%c0_51, %c0_52] : memref<2x256xf32, #tpu.memory_space<vmem>>, vector<2x256xf32>
    %57 = arith.truncf %56 : vector<2x256xf32> to vector<2x256xbf16>
    %c0_53 = arith.constant 0 : index
    %c0_54 = arith.constant 0 : index
    %58 = vector.load %arg10[%c0_53, %c0_54] : memref<256x128xbf16, #tpu.memory_space<vmem>>, vector<256x128xbf16>
    %cst = arith.constant dense<0.000000e+00> : vector<2x128xf32>
    %59 = tpu.matmul %57, %58, %cst {dimension_numbers = #tpu.dot_dimension_numbers<[1], [0], [0], [1], [0, 0, 1, 1], [], []>} : vector<2x256xbf16>, vector<256x128xbf16>, vector<2x128xf32> -> vector<2x128xf32>
    %c0_55 = arith.constant 0 : index
    %c0_56 = arith.constant 0 : index
    %60 = vector.load %arg11[%c0_55, %c0_56] : memref<1x128xf32, #tpu.memory_space<vmem>>, vector<1x128xf32>
    %61 = vector.broadcast %60 : vector<1x128xf32> to vector<2x128xf32>
    %62 = arith.addf %59, %61 : vector<2x128xf32>
    %cst_57 = arith.constant 0.000000e+00 : f32
    %63 = vector.broadcast %cst_57 : f32 to vector<2x128xf32>
    %64 = arith.maximumf %62, %63 : vector<2x128xf32>
    %c2_i32_58 = arith.constant 2 : i32
    %65 = tpu.memref_slice %arg15[%c2_i32_58] : memref<4x!tpu.dma_semaphore, #tpu.memory_space<semaphore_mem>> -> memref<1x!tpu.dma_semaphore, #tpu.memory_space<semaphore_mem>>
    %66 = tpu.memref_squeeze %65 : memref<1x!tpu.dma_semaphore, #tpu.memory_space<semaphore_mem>> -> memref<!tpu.dma_semaphore, #tpu.memory_space<semaphore_mem>>
    tpu.wait_dma2 semaphore(%66 : memref<!tpu.dma_semaphore, #tpu.memory_space<semaphore_mem>>) src(%arg6 : memref<128x128xbf16, #tpu.memory_space<any>>) dst(%arg12 : memref<128x128xbf16, #tpu.memory_space<vmem>>)
    %c3_i32_59 = arith.constant 3 : i32
    %67 = tpu.memref_slice %arg15[%c3_i32_59] : memref<4x!tpu.dma_semaphore, #tpu.memory_space<semaphore_mem>> -> memref<1x!tpu.dma_semaphore, #tpu.memory_space<semaphore_mem>>
    %68 = tpu.memref_squeeze %67 : memref<1x!tpu.dma_semaphore, #tpu.memory_space<semaphore_mem>> -> memref<!tpu.dma_semaphore, #tpu.memory_space<semaphore_mem>>
    tpu.wait_dma2 semaphore(%68 : memref<!tpu.dma_semaphore, #tpu.memory_space<semaphore_mem>>) src(%arg7 : memref<1x128xf32, #tpu.memory_space<any>>) dst(%arg13 : memref<1x128xf32, #tpu.memory_space<vmem>>)
    %69 = arith.truncf %64 : vector<2x128xf32> to vector<2x128xbf16>
    %c0_60 = arith.constant 0 : index
    %c0_61 = arith.constant 0 : index
    %70 = vector.load %arg12[%c0_60, %c0_61] : memref<128x128xbf16, #tpu.memory_space<vmem>>, vector<128x128xbf16>
    %cst_62 = arith.constant dense<0.000000e+00> : vector<2x128xf32>
    %71 = tpu.matmul %69, %70, %cst_62 {dimension_numbers = #tpu.dot_dimension_numbers<[1], [0], [0], [1], [0, 0, 1, 1], [], []>} : vector<2x128xbf16>, vector<128x128xbf16>, vector<2x128xf32> -> vector<2x128xf32>
    %c0_63 = arith.constant 0 : index
    %c0_64 = arith.constant 0 : index
    %72 = vector.load %arg13[%c0_63, %c0_64] : memref<1x128xf32, #tpu.memory_space<vmem>>, vector<1x128xf32>
    %73 = vector.broadcast %72 : vector<1x128xf32> to vector<2x128xf32>
    %74 = arith.addf %71, %73 : vector<2x128xf32>
    %c0_65 = arith.constant 0 : index
    %c0_66 = arith.constant 0 : index
    %75 = vector.load %arg8[%c0_65, %c0_66] : memref<2x128xf32, #tpu.memory_space<vmem>>, vector<2x128xf32>
    tpu.vector_store %arg8[%c0_65, %c0_66], %74 {strides = array<i32>} : memref<2x128xf32, #tpu.memory_space<vmem>>, vector<2x128xf32>,
    return
  }
  func.func @transform_5(%arg0: i32, %arg1: memref<2xi32, #tpu.memory_space<smem>>, %arg2: memref<2xi32, #tpu.memory_space<smem>>) -> (i32, i32) {
    %c0_i32 = arith.constant 0 : i32
    %c0_i32_0 = arith.constant 0 : i32
    %c0_i32_1 = arith.constant 0 : i32
    return %c0_i32, %c0_i32_0 : i32, i32
  }
}

</mosaic_0001>

<bundles_post_ra>
// kernel: _re_forward.1
= control target key start
LH: loop header
LB: loop body
LE: loop exit
PB: predicated region body
PF: predicated region fallthrough
CT: control target
= control target key end

     0   :  { %s866_s0 = inlined_call_operand.vmem [shape: s32[2], index: 0, kind: input, shape index: {}]   ;;  %s867_s2 = inlined_call_operand.hbm [shape: f32[2,16,128], index: 2, kind: input, shape index: {}]   ;;  %s868_s3 = inlined_call_operand.hbm [shape: bf16[256,128], index: 3, kind: input, shape index: {}]   ;;  %s869_s4 = inlined_call_operand.vmem [shape: f32[1,128], index: 4, kind: input, shape index: {}]   ;;  %s870_s5 = inlined_call_operand.hbm [shape: bf16[128,128], index: 5, kind: input, shape index: {}]   ;;  %s871_s6 = inlined_call_operand.vmem [shape: f32[1,128], index: 6, kind: input, shape index: {}]   ;;  %s872_s7 = inlined_call_operand.vmem [shape: f32[2,128], index: 7, kind: output, shape index: {}]   ;;  %s873_s1 = inlined_call_operand.vmem [shape: s32[2], index: 1, kind: input, shape index: {}]  }
   0x1   :  { %s12_s26 = sshll.u32 %s866_s0, 4  ;;  %s16_s29 = sshll.u32 %s873_s1, 4  ;;  %s13_s26 = int_to_ptr.vmem [resolvable:$true] %s12_s26  ;;  %s17_s29 = int_to_ptr.vmem [resolvable:$true] %s16_s29 }
   0x2   :  { %s522_s30 = scalar_lea.vmem %s13_s26, 16  ;;  %p527_p1 = scmp.lt.s32.totalorder %s13_s26, %s13_s26 }
   0x3   :  { %p523_p0 = scmp.ne.s32.totalorder %s13_s26, %s522_s30  ;;  %p528_p2 = scmp.lt.s32.totalorder %s522_s30, %s522_s30 }
   0x5   :  { %p529_p3 = por %p528_p2, %p527_p1 }
   0x7   :  { %p530_p4 = pnand %p529_p3, %p523_p0 }
   0x9   :  { %533 = shalt.err (!%p530_p4)  }
   0xa   :  { %s706_s8 = smov [#allocation10]   ;;  %s534_s9 = scalar_lea.vmem %s17_s29, 16 }
   0xb   :  { %15 = dma.vmem_to_smem %s13_s26, 16, %s706_s8, [#allocation9] }
   0xc   :  { %p535_p5 = scmp.ne.s32.totalorder %s17_s29, %s534_s9  ;;  %p539_p6 = scmp.lt.s32.totalorder %s17_s29, %s17_s29 }
   0xd   :  { %p540_p7 = scmp.lt.s32.totalorder %s534_s9, %s534_s9 }
   0xf   :  { %p541_p8 = por %p540_p7, %p539_p6 }
  0x11   :  { %p542_p9 = pnand %p541_p8, %p535_p5 }
  0x13   :  { %545 = shalt.err (!%p542_p9)  }
  0x14   :  { %s707_s0 = smov [#allocation11]  }
  0x15   :  { %19 = dma.vmem_to_smem %s17_s29, 16, %s707_s0, [#allocation9] }
  0x16   :  { %688 = dma.done.wait [#allocation9], 32 }
  0x17   :  { %689 = vsyncadd [#allocation9], 4294967264 }
  0x18   :  { %21 = sfence }
  0x19   :  { %s23_s1 = sld [smem:[#allocation10]]  ;;  %v116_v0 = vld [vmem:[%s869_s4] sm:$0x1]  ;;  %s708_s12 = smov [#allocation2]  }
  0x1a   :  { %s36_s13 = sshll.u32 %s708_s12, 4  ;;  %s765_s14 = sld [smem:[#allocation11]]  ;;  %117 = vst [vmem:[#allocation4] sm:$0x1] %v116_v0  ;;  %s767_s13 = int_to_ptr.vmem [resolvable:$true] %s36_s13 }
  0x1b   :  { %s709_s15 = smov [#allocation2 + $0x2]   ;;  %s769_s17 = sld [smem:[#allocation10 + $0x1]] }
  0x1c   :  { %s51_s16 = sshll.u32 %s709_s15, 4  ;;  %s710_s18 = smov [#allocation2 + $0x1]   ;;  %s771_s16 = int_to_ptr.vmem [resolvable:$true] %s51_s16 }
  0x1d   :  { %s67_s19 = sshll.u32 %s710_s18, 4  ;;  %s773_s20 = sld [smem:[#allocation11 + $0x1]]  ;;  %s775_s19 = int_to_ptr.vmem [resolvable:$true] %s67_s19 }
  0x1e   :  { %s784_s28 = scalar_lea.hbm %s867_s2, 512 }
  0x1f   :  { %s446_s21 = sshll.u32 %s23_s1, 4 }
  0x20   :  { %s28_s23 = scalar_lea.hbm %s867_s2, %s446_s21  ;;  %s447_s24 = sshll.u32 %s765_s14, 4 }
  0x21   :  { %s546_s25 = scalar_lea.hbm %s28_s23, 16  ;;  %p549_p11 = scmp.lt.u32.totalorder %s28_s23, %s867_s2 }
  0x22   :  { %p547_p10 = scmp.ne.s32.totalorder %s28_s23, %s546_s25  ;;  %p550_p12 = scmp.lt.u32.totalorder %s784_s28, %s546_s25 }
  0x23   :  { %p552_p0 = scmp.lt.u32.totalorder %s546_s25, %s28_s23 }
  0x24   :  { %p551_p13 = por %p550_p12, %p549_p11 }
  0x26   :  { %p553_p1 = por %p552_p0, %p551_p13 }
  0x28   :  { %p554_p2 = pnand %p553_p1, %p547_p10 }
  0x2a   :  { %557 = shalt.err (!%p554_p2)  }
  0x2b   :  { %s558_s8 = scalar_lea.vmem %s767_s13, 16  ;;  %s793_s9 = scalar_lea.vmem %s767_s13, 64 }
  0x2c   :  { %p559_p3 = scmp.ne.s32.totalorder %s767_s13, %s558_s8  ;;  %p563_p4 = scmp.lt.s32.totalorder %s767_s13, %s767_s13 }
  0x2d   :  { %p564_p5 = scmp.lt.s32.totalorder %s793_s9, %s558_s8 }
  0x2f   :  { %p565_p6 = por %p564_p5, %p563_p4 }
  0x31   :  { %p566_p7 = pnand %p565_p6, %p559_p3 }
  0x33   :  { %569 = shalt.err (!%p566_p7)  }
  0x34   :  { %39 = dma.hbm_to_vmem [thread:$0]  %s28_s23, 16, %s767_s13, [#allocation7] }
  0x35   :  { %s41_s10 = scalar_lea.hbm %s867_s2, %s447_s24  ;;  %s448_s11 = sshll.u32 %s769_s17, 4 }
  0x36   :  { %s570_s12 = scalar_lea.hbm %s41_s10, 16  ;;  %p573_p9 = scmp.lt.u32.totalorder %s41_s10, %s867_s2 }
  0x37   :  { %p571_p8 = scmp.ne.s32.totalorder %s41_s10, %s570_s12  ;;  %p574_p10 = scmp.lt.u32.totalorder %s784_s28, %s570_s12 }
  0x38   :  { %p576_p12 = scmp.lt.u32.totalorder %s570_s12, %s41_s10 }
  0x39   :  { %p575_p11 = por %p574_p10, %p573_p9 }
  0x3b   :  { %p577_p13 = por %p576_p12, %p575_p11 }
  0x3d   :  { %p578_p0 = pnand %p577_p13, %p571_p8 }
  0x3f   :  { %581 = shalt.err (!%p578_p0)  }
  0x40   :  { %s582_s18 = scalar_lea.vmem %s771_s16, 16  ;;  %p587_p2 = scmp.lt.s32.totalorder %s771_s16, %s767_s13 }
  0x41   :  { %p583_p1 = scmp.ne.s32.totalorder %s771_s16, %s582_s18  ;;  %p588_p3 = scmp.lt.s32.totalorder %s793_s9, %s582_s18 }
  0x43   :  { %p589_p4 = por %p588_p3, %p587_p2 }
  0x45   :  { %p590_p5 = pnand %p589_p4, %p583_p1 }
  0x47   :  { %593 = shalt.err (!%p590_p5)  }
  0x48   :  { %54 = dma.hbm_to_vmem [thread:$0]  %s41_s10, 16, %s771_s16, [#allocation7 + $0x2] }
  0x49   :  { %s419_s4 = scalar_lea.hbm %s867_s2, %s448_s11  ;;  %s449_s22 = sshll.u32 %s773_s20, 4 }
  0x4a   :  { %s420_s23 = scalar_lea.hbm %s419_s4, 256  ;;  %s422_s26 = scalar_lea.hbm %s867_s2, %s449_s22 }
  0x4b   :  { %s618_s27 = scalar_lea.hbm %s419_s4, 272  ;;  %p597_p7 = scmp.lt.u32.totalorder %s420_s23, %s867_s2 }
  0x4c   :  { %p595_p6 = scmp.ne.s32.totalorder %s420_s23, %s618_s27  ;;  %p598_p8 = scmp.lt.u32.totalorder %s784_s28, %s618_s27 }
  0x4d   :  { %p600_p10 = scmp.lt.u32.totalorder %s618_s27, %s420_s23 }
  0x4e   :  { %p599_p9 = por %p598_p8, %p597_p7 }
  0x50   :  { %p601_p11 = por %p600_p10, %p599_p9 }
  0x52   :  { %p602_p12 = pnand %p601_p11, %p595_p6 }
  0x54   :  { %605 = shalt.err (!%p602_p12)  }
  0x55   :  { %s606_s16 = scalar_lea.vmem %s775_s19, 16  ;;  %p611_p0 = scmp.lt.s32.totalorder %s775_s19, %s767_s13 }
  0x56   :  { %p607_p13 = scmp.ne.s32.totalorder %s775_s19, %s606_s16  ;;  %p612_p1 = scmp.lt.s32.totalorder %s793_s9, %s606_s16 }
  0x58   :  { %p613_p2 = por %p612_p1, %p611_p0 }
  0x5a   :  { %p614_p3 = pnand %p613_p2, %p607_p13 }
  0x5c   :  { %617 = shalt.err (!%p614_p3)  }
  0x5d   :  { %70 = dma.hbm_to_vmem [thread:$0]  %s420_s23, 16, %s775_s19, [#allocation7 + $0x1] }
  0x5e   :  { %s423_s20 = scalar_lea.hbm %s422_s26, 256  ;;  %s711_s8 = smov [#allocation2 + $0x3]  }
  0x5f   :  { %s83_s0 = sshll.u32 %s711_s8, 4  ;;  %s712_s1 = smov [#allocation3]   ;;  %s84_s0 = int_to_ptr.vmem [resolvable:$true] %s83_s0 }
  0x60   :  { %s94_s10 = sshll.u32 %s712_s1, 4  ;;  %s643_s11 = scalar_lea.hbm %s422_s26, 272  ;;  %s95_s10 = int_to_ptr.vmem [resolvable:$true] %s94_s10 }
  0x61   :  { %p620_p4 = scmp.ne.s32.totalorder %s423_s20, %s643_s11  ;;  %p622_p5 = scmp.lt.u32.totalorder %s423_s20, %s867_s2 }
  0x62   :  { %p623_p6 = scmp.lt.u32.totalorder %s784_s28, %s643_s11  ;;  %p625_p8 = scmp.lt.u32.totalorder %s643_s11, %s423_s20 }
  0x64   :  { %p624_p7 = por %p623_p6, %p622_p5 }
  0x66   :  { %p626_p9 = por %p625_p8, %p624_p7 }
  0x68   :  { %p627_p10 = pnand %p626_p9, %p620_p4 }
  0x6a   :  { %630 = shalt.err (!%p627_p10)  }
  0x6b   :  { %s631_s15 = scalar_lea.vmem %s84_s0, 16  ;;  %p636_p12 = scmp.lt.s32.totalorder %s84_s0, %s767_s13 }
  0x6c   :  { %p632_p11 = scmp.ne.s32.totalorder %s84_s0, %s631_s15  ;;  %p637_p13 = scmp.lt.s32.totalorder %s793_s9, %s631_s15 }
  0x6e   :  { %p638_p0 = por %p637_p13, %p636_p12 }
  0x70   :  { %p639_p1 = pnand %p638_p0, %p632_p11 }
  0x72   :  { %642 = shalt.err (!%p639_p1)  }
  0x73   :  { %86 = dma.hbm_to_vmem [thread:$0]  %s423_s20, 16, %s84_s0, [#allocation7 + $0x3] }
  0x74   :  { %s644_s2 = scalar_lea.hbm %s868_s3, 2048 }
  0x75   :  { %p645_p2 = scmp.ne.s32.totalorder %s868_s3, %s644_s2  ;;  %p648_p3 = scmp.lt.u32.totalorder %s644_s2, %s868_s3 }
  0x77   :  { %p650_p4 = pnand %p648_p3, %p645_p2 }
  0x79   :  { %653 = shalt.err (!%p650_p4)  }
  0x7a   :  { %s654_s13 = scalar_lea.vmem %s95_s10, 2048  ;;  %p659_p6 = scmp.lt.s32.totalorder %s95_s10, %s95_s10 }
  0x7b   :  { %p655_p5 = scmp.ne.s32.totalorder %s95_s10, %s654_s13  ;;  %p660_p7 = scmp.lt.s32.totalorder %s654_s13, %s654_s13 }
  0x7d   :  { %p661_p8 = por %p660_p7, %p659_p6 }
  0x7f   :  { %p662_p9 = pnand %p661_p8, %p655_p5 }
  0x81   :  { %665 = shalt.err (!%p662_p9)  }
  0x82   :  { %97 = dma.hbm_to_vmem [thread:$0]  %s868_s3, 2048, %s95_s10, [#allocation8] }
  0x83   :  { %142 = vsyncadd [#allocation8 + $0x1], 16  ;;  %v173_v1 = vld [vmem:[%s871_s6] sm:$0x1]  ;;  %s713_s25 = smov [#allocation5]   ;;  %s666_s30 = scalar_lea.hbm %s870_s5, 1024 }
  0x84   :  { %s151_s26 = sshll.u32 %s713_s25, 4  ;;  %174 = vst [vmem:[#allocation6] sm:$0x1] %v173_v1  ;;  %p667_p10 = scmp.ne.s32.totalorder %s870_s5, %s666_s30  ;;  %s152_s26 = int_to_ptr.vmem [resolvable:$true] %s151_s26 }
  0x85   :  { %p670_p11 = scmp.lt.u32.totalorder %s666_s30, %s870_s5 }
  0x87   :  { %p672_p12 = pnand %p670_p11, %p667_p10 }
  0x89   :  { %675 = shalt.err (!%p672_p12)  }
  0x8a   :  { %s676_s3 = scalar_lea.vmem %s152_s26, 1024  ;;  %p681_p0 = scmp.lt.s32.totalorder %s152_s26, %s152_s26 }
  0x8b   :  { %p677_p13 = scmp.ne.s32.totalorder %s152_s26, %s676_s3  ;;  %p682_p1 = scmp.lt.s32.totalorder %s676_s3, %s676_s3 }
  0x8d   :  { %p683_p2 = por %p682_p1, %p681_p0 }
  0x8f   :  { %p684_p3 = pnand %p683_p2, %p677_p13 }
  0x91   :  { %687 = shalt.err (!%p684_p3)  }
  0x92   :  { %154 = dma.hbm_to_vmem [thread:$0]  %s870_s5, 1024, %s152_s26, [#allocation8 + $0x2] }
  0x93   :  { %199 = vsyncadd [#allocation8 + $0x3], 16 }
  0x94   :  { %690 = dma.done.wait [#allocation7], 16 }
  0x95   :  { %691 = vsyncadd [#allocation7], 4294967280 }
  0x96   :  { %692 = dma.done.wait [#allocation7 + $0x2], 16 }
  0x97   :  { %693 = vsyncadd [#allocation7 + $0x2], 4294967280 }
  0x98   :  { %694 = dma.done.wait [#allocation7 + $0x1], 16 }
  0x99   :  { %695 = vsyncadd [#allocation7 + $0x1], 4294967280 }
  0x9a   :  { %696 = dma.done.wait [#allocation7 + $0x3], 16 }
  0x9b   :  { %697 = vsyncadd [#allocation7 + $0x3], 4294967280 }
  0x9c   :  { %698 = dma.done.wait [#allocation8], 2048 }
  0x9d   :  { %699 = vsyncadd [#allocation8], 4294965248 }
  0x9e   :  { %700 = dma.done.wait [#allocation8 + $0x1], 16 }
  0x9f   :  { %701 = vsyncadd [#allocation8 + $0x1], 4294967280  ;;  %v237_v2 = vld [vmem:[#allocation3 + $0x40] sm:$0xff]  ;;  %v238_v4 = vld [vmem:[#allocation3 + $0x48] sm:$0xff] }
  0xa0   :  { %v229_v3 = vld [vmem:[#allocation3] sm:$0xff]  ;;  %461 = vmatprep.subr.bf16.mxu0 %v237_v2  ;;  %v230_v5 = vld [vmem:[#allocation3 + $0x8] sm:$0xff]  ;;  %v239_v6 = vld [vmem:[#allocation3 + $0x50] sm:$0xff] }
  0xa1   :  { %462 = vmatpush3.bf16.msra.mxu0 %v229_v3  ;;  %v450_v7 = vld.sshfl [vmem:[#allocation2] sm:$0x33 pattern:$0x76325410]  ;;  %v231_v9 = vld [vmem:[#allocation3 + $0x10] sm:$0xff]  ;;  %v241_v13 = vld [vmem:[#allocation3 + $0x60] sm:$0xff] }
  0xa2   :  { %463 = vmatprep.subr.bf16.mxu0 %v238_v4  ;;  %v224_v8 = vcombine.high %v450_v7, %v450_v7  ;;  %v240_v10 = vld [vmem:[#allocation3 + $0x58] sm:$0xff]  ;;  %v233_v14 = vld [vmem:[#allocation3 + $0x20] sm:$0xff]  ;;  %v242_v15 = vld [vmem:[#allocation3 + $0x68] sm:$0xff]  ;;  %v227_v21 = vpack.c.bf16 %v450_v7, %v450_v7 }
  0xa3   :  { %v232_v12 = vld [vmem:[#allocation3 + $0x18] sm:$0xff]  ;;  %v234_v16 = vld [vmem:[#allocation3 + $0x28] sm:$0xff]  ;;  %v243_v17 = vld [vmem:[#allocation3 + $0x70] sm:$0xff] }
  0xa4   :  { %v228_v11 = vpack.c.bf16 %v224_v8, %v224_v8  ;;  %v235_v18 = vld [vmem:[#allocation3 + $0x30] sm:$0xff]  ;;  %v244_v19 = vld [vmem:[#allocation3 + $0x78] sm:$0xff]  ;;  %v451_v23 = vld [vmem:[#allocation4] ss:$0 sm:$0xff] }
  0xa5   :  { %464 = vmatpush3.bf16.msra.mxu0 %v230_v5  ;;  %v236_v20 = vld [vmem:[#allocation3 + $0x38] sm:$0xff] }
  0xa6   :  { %465 = vmatprep.subr.bf16.mxu0 %v239_v6  ;;  %284 = vmatprep.mubr.bf16.mxu0 %v228_v11 }
  0xa9   :  { %466 = vmatpush3.bf16.msra.mxu0 %v231_v9 }
  0xaa   :  { %467 = vmatprep.subr.bf16.mxu0 %v240_v10 }
  0xad   :  { %468 = vmatpush3.bf16.msra.mxu0 %v232_v12 }
  0xae   :  { %469 = vmatprep.subr.bf16.mxu0 %v241_v13 }
  0xb1   :  { %470 = vmatpush3.bf16.msra.mxu0 %v233_v14 }
  0xb2   :  { %471 = vmatprep.subr.bf16.mxu0 %v242_v15 }
  0xb5   :  { %472 = vmatpush3.bf16.msra.mxu0 %v234_v16 }
  0xb6   :  { %473 = vmatprep.subr.bf16.mxu0 %v243_v17 }
  0xb9   :  { %474 = vmatpush3.bf16.msra.mxu0 %v235_v18 }
  0xba   :  { %475 = vmatprep.subr.bf16.mxu0 %v244_v19 }
  0xbd   :  { %476 = vmatpush3.bf16.msra.mxu0 %v236_v20 }
  0xc0   :  { %285 = vmatmul.mubr.bf16.vlgmr.msra.gmra.mrb[0].mxu0 %v227_v21 }
 0x193   :  { %v477_v22 = vpop.f32.mrb[0].mxu0 }
 0x194   :  { %v478_v24 = vpop.f32.mrb[1].mxu0 }
 0x195   :  { %v479_v25 = vadd.f32 %v478_v24, %v477_v22  ;;  %v480_v26 = vpop.f32.mrb[2].mxu0 }
 0x196   :  { %v481_v27 = vpop.f32.mrb[3].mxu0 }
 0x197   :  { %v287_v28 = vadd.f32 %v479_v25, %v451_v23 }
 0x199   :  { %v292_v29 = vmax.f32 %v287_v28, 0.0 }
 0x19a   :  { %702 = dma.done.wait [#allocation8 + $0x2], 1024 }
 0x19b   :  { %703 = vsyncadd [#allocation8 + $0x2], 4294966272 }
 0x19c   :  { %704 = dma.done.wait [#allocation8 + $0x3], 16 }
 0x19d   :  { %705 = vsyncadd [#allocation8 + $0x3], 4294967280  ;;  %v714_v30 = vmov 0.0   ;;  %vm715_vm0 = vmmov 0   ;;  %v300_v31 = vld [vmem:[#allocation5] sm:$0xff]  ;;  %v301_v32 = vld [vmem:[#allocation5 + $0x8] sm:$0xff]  ;;  %v299_v39 = vpack.c.bf16 %v292_v29, %v292_v29 }
 0x19e   :  { %492 = vmatprep.subr.bf16.mxu1 %v714_v30  ;;  %508 = vmatprep.mubr.msk.bf16.mxu1 %vm715_vm0, %v714_v30  ;;  %v302_v33 = vld [vmem:[#allocation5 + $0x10] sm:$0xff]  ;;  %v303_v34 = vld [vmem:[#allocation5 + $0x18] sm:$0xff]  ;;  %v304_v35 = vld [vmem:[#allocation5 + $0x20] sm:$0xff] }
 0x19f   :  { %493 = vmatpush3.bf16.msra.mxu1 %v300_v31  ;;  %v305_v36 = vld [vmem:[#allocation5 + $0x28] sm:$0xff]  ;;  %v306_v37 = vld [vmem:[#allocation5 + $0x30] sm:$0xff]  ;;  %v307_v38 = vld [vmem:[#allocation5 + $0x38] sm:$0xff] }
 0x1a0   :  { %494 = vmatprep.subr.bf16.mxu1 %v714_v30  ;;  %v452_v40 = vld [vmem:[#allocation6] ss:$0 sm:$0xff] }
 0x1a3   :  { %495 = vmatpush3.bf16.msra.mxu1 %v301_v32 }
 0x1a4   :  { %496 = vmatprep.subr.bf16.mxu1 %v714_v30 }
 0x1a7   :  { %497 = vmatpush3.bf16.msra.mxu1 %v302_v33 }
 0x1a8   :  { %498 = vmatprep.subr.bf16.mxu1 %v714_v30 }
 0x1ab   :  { %499 = vmatpush3.bf16.msra.mxu1 %v303_v34 }
 0x1ac   :  { %500 = vmatprep.subr.bf16.mxu1 %v714_v30 }
 0x1af   :  { %501 = vmatpush3.bf16.msra.mxu1 %v304_v35 }
 0x1b0   :  { %502 = vmatprep.subr.bf16.mxu1 %v714_v30 }
 0x1b3   :  { %503 = vmatpush3.bf16.msra.mxu1 %v305_v36 }
 0x1b4   :  { %504 = vmatprep.subr.bf16.mxu1 %v714_v30 }
 0x1b7   :  { %505 = vmatpush3.bf16.msra.mxu1 %v306_v37 }
 0x1b8   :  { %506 = vmatprep.subr.bf16.mxu1 %v714_v30 }
 0x1bb   :  { %507 = vmatpush3.bf16.msra.mxu1 %v307_v38 }
 0x1be   :  { %509 = vmatmul.mubr.bf16.vlgmr.msra.gmra.mrb[0].mxu1 %v299_v39 }
 0x291   :  { %v349_v41 = vpop.f32.mrb[0].mxu1 }
 0x292   :  { %v350_v42 = vadd.f32 %v452_v40, %v349_v41  ;;  %v510_v43 = vpop.f32.mrb[1].mxu1 }
 0x293   :  { %v352_v44 = vpop.f32.mrb[2].mxu1 }
 0x294   :  { %355 = vst [vmem:[%s872_s7] sm:$0x3] %v350_v42  ;;  %v511_v45 = vpop.f32.mrb[3].mxu1 }
 0x295   :  { %360 = vsyncmov [#allocation7] }
 0x298   :  { %s361_s11 = vpop.sfrf %360 }
 0x299   :  { %p453_p4 = scmp.ne.s32.totalorder %s361_s11, 0 }
 0x29b   :  { %365 = shalt.err (%p453_p4)  }
 0x29c   :  { %367 = vsyncmov [#allocation7 + $0x1] }
 0x29f   :  { %s368_s12 = vpop.sfrf %367 }
 0x2a0   :  { %p454_p5 = scmp.ne.s32.totalorder %s368_s12, 0 }
 0x2a2   :  { %372 = shalt.err (%p454_p5)  }
 0x2a3   :  { %374 = vsyncmov [#allocation7 + $0x2] }
 0x2a6   :  { %s375_s14 = vpop.sfrf %374 }
 0x2a7   :  { %p455_p6 = scmp.ne.s32.totalorder %s375_s14, 0 }
 0x2a9   :  { %379 = shalt.err (%p455_p6)  }
 0x2aa   :  { %381 = vsyncmov [#allocation7 + $0x3] }
 0x2ad   :  { %s382_s15 = vpop.sfrf %381 }
 0x2ae   :  { %p456_p7 = scmp.ne.s32.totalorder %s382_s15, 0 }
 0x2b0   :  { %386 = shalt.err (%p456_p7)  }
 0x2b1   :  { %387 = vsyncmov [#allocation8] }
 0x2b4   :  { %s388_s19 = vpop.sfrf %387 }
 0x2b5   :  { %p457_p8 = scmp.ne.s32.totalorder %s388_s19, 0 }
 0x2b7   :  { %392 = shalt.err (%p457_p8)  }
 0x2b8   :  { %394 = vsyncmov [#allocation8 + $0x1] }
 0x2bb   :  { %s395_s7 = vpop.sfrf %394 }
 0x2bc   :  { %p458_p9 = scmp.ne.s32.totalorder %s395_s7, 0 }
 0x2be   :  { %399 = shalt.err (%p458_p9)  }
 0x2bf   :  { %401 = vsyncmov [#allocation8 + $0x2] }
 0x2c2   :  { %s402_s18 = vpop.sfrf %401 }
 0x2c3   :  { %p459_p10 = scmp.ne.s32.totalorder %s402_s18, 0 }
 0x2c5   :  { %406 = shalt.err (%p459_p10)  }
 0x2c6   :  { %408 = vsyncmov [#allocation8 + $0x3] }
 0x2c9   :  { %s409_s2 = vpop.sfrf %408 }
 0x2ca   :  { %p460_p11 = scmp.ne.s32.totalorder %s409_s2, 0 }
 0x2cc   :  { %413 = shalt.err (%p460_p11)  }

</bundles_post_ra>
